<compile_context>
chip_gen: v7x
topology: tpu7x:2x2x1
jax: 0.10.0
libtpu: 0.0.40
codegen_flags: <defaults>
</compile_context>

<pallas_src>
import functools

import numpy as np
import jax
import jax.numpy as jnp
from jax.experimental import pallas as pl
from jax.experimental.pallas import tpu as pltpu


def _sigmoid(x):
    # numerically stable logistic; one shared reciprocal (halves VALU divides)
    z = jnp.exp(-jnp.abs(x))
    r = 1.0 / (1.0 + z)
    return jnp.where(x >= 0.0, r, z * r)


def _swish(x):
    return x * _sigmoid(x)


# --------------------------------------------------------------------------
# Pallas kernels
# --------------------------------------------------------------------------
def _mlp2_kernel(x_ref, w1_ref, b1_ref, w2_ref, b2_ref, o_ref, *, last_swish):
    h = jnp.dot(x_ref[...], w1_ref[...], preferred_element_type=jnp.float32) + b1_ref[...]
    h = _swish(h)
    o = jnp.dot(h, w2_ref[...], preferred_element_type=jnp.float32) + b2_ref[...]
    if last_swish:
        o = _swish(o)
    o_ref[...] = o


def mlp2(x, w1, b1, w2, b2, *, last_swish):
    """Linear -> Swish -> Linear (-> Swish); one launch, whole arrays in VMEM."""
    n = x.shape[0]
    d_out = w2.shape[1]
    return pl.pallas_call(
        functools.partial(_mlp2_kernel, last_swish=last_swish),
        out_shape=jax.ShapeDtypeStruct((n, d_out), jnp.float32),
    )(x, w1, b1.reshape(1, -1), w2, b2.reshape(1, -1))


def _gated_layers_kernel(
        h0_ref, gd_ref, gs_ref, aggm_ref, nm_ref, econst_ref, vars_ref,
        m1w_ref, m1wc_ref, m1b_ref, m2w_ref, m2b_ref,
        u1w_ref, u1wv_ref, u1b_ref, u2w_ref, u2b_ref,
        h_ref, *, hidden, eps):
    H = hidden
    l = pl.program_id(0)

    # h is carried in the output block (same block index every layer => stays
    # resident in VMEM, written back to HBM only once at the end of the grid).
    @pl.when(l == 0)
    def _():
        h_ref[...] = h0_ref[...]

    h = h_ref[...]

    # ---- message net (gate | layer fused on the 2H output lanes) ----------
    # one-hot gather matmuls replace h[dst] / h[src] gathers
    h_dst = jnp.dot(gd_ref[...], h, preferred_element_type=jnp.float32)      # [E, H]
    h_src = jnp.dot(gs_ref[...], h, preferred_element_type=jnp.float32)      # [E, H]
    m1w = m1w_ref[...]
    pre = (jnp.dot(h_dst, m1w[:H], preferred_element_type=jnp.float32)
           + jnp.dot(h_src, m1w[H:], preferred_element_type=jnp.float32)
           + jnp.dot(econst_ref[...], m1wc_ref[...], preferred_element_type=jnp.float32)
           + m1b_ref[...])
    msg = _swish(pre)
    pre2 = jnp.dot(msg, m2w_ref[...], preferred_element_type=jnp.float32) + m2b_ref[...]
    msg = _swish(pre2)                                                        # [E, 2H]

    # ---- mean aggregation over incoming edges (constant [N, E] matrix) ----
    aggr = jnp.dot(aggm_ref[...], msg, preferred_element_type=jnp.float32)    # [N, 2H]

    # ---- update net; `variables` folded in as a rank-1 contribution -------
    u1w = u1w_ref[...]
    vvar = vars_ref[...]
    wvar = u1wv_ref[...]
    if vvar.shape[1] == 1:
        var_term = vvar * wvar                      # [N,1] * [1,2H]: rank-1 VPU add
    else:
        var_term = jnp.dot(vvar, wvar, preferred_element_type=jnp.float32)
    upre = (jnp.dot(h, u1w[:H], preferred_element_type=jnp.float32)
            + jnp.dot(aggr, u1w[H:], preferred_element_type=jnp.float32)
            + var_term
            + u1b_ref[...])
    upd = _swish(upre)
    upd = jnp.dot(upd, u2w_ref[...], preferred_element_type=jnp.float32) + u2b_ref[...]

    # ---- per-graph InstanceNorm (affine=False, biased var) + gated skip ---
    mean = jnp.dot(nm_ref[...], upd, preferred_element_type=jnp.float32)
    cent = upd - mean
    var = jnp.dot(nm_ref[...], cent * cent, preferred_element_type=jnp.float32)
    xn = cent * jax.lax.rsqrt(var + eps)
    tau = _sigmoid(xn[:, :H])                       # gate half
    lay = xn[:, H:]                                 # layer half
    h_ref[...] = (1.0 - tau) * h + tau * _swish(lay)


def gated_layers(h0, gd, gs, aggm, nm, edge_const, variables, sp, *, eps=1e-5):
    """All gated GNN layers in ONE pallas_call, grid over stacked layer weights."""
    N, H = h0.shape
    E = gd.shape[0]
    L, C, H2 = sp['m1wc'].shape
    n_vars = variables.shape[1]

    def const_spec(*shape):
        zeros = (0,) * len(shape)
        return pl.BlockSpec(shape, lambda l: zeros)

    def layer_spec(*shape):
        zeros = (0,) * len(shape)
        return pl.BlockSpec((None,) + shape, lambda l: (l,) + zeros)

    # advisory cost estimate so XLA schedules the tiny surrounding glue sensibly
    mm = (2 * E * N * H + 2 * E * H * H2 + E * C * H2 + E * H2 * H2
          + N * E * H2 + N * H * H2 + 2 * N * H2 * H2 + 2 * N * N * H2)
    cost = pl.CostEstimate(
        flops=int(2 * L * mm),
        transcendentals=int(L * (2 * E * H2 + N * H2 + 2 * N * H)),
        bytes_accessed=int(4 * (L * (3 * H2 * H2 + C * H2 + 3 * H * H2
                                     + n_vars * H2 + 4 * H2)
                                + N * H + 2 * E * N + N * E + N * N
                                + E * C + N * n_vars + N * H)))

    return pl.pallas_call(
        functools.partial(_gated_layers_kernel, hidden=H, eps=eps),
        out_shape=jax.ShapeDtypeStruct((N, H), jnp.float32),
        grid=(L,),
        in_specs=[
            const_spec(N, H),          # h0   (initial embedding)
            const_spec(E, N),          # gd   (one-hot dst gather)
            const_spec(E, N),          # gs   (one-hot src gather)
            const_spec(N, E),          # aggm (segment-mean over dst)
            const_spec(N, N),          # nm   (per-graph mean broadcast)
            const_spec(E, C),          # layer-invariant edge features (zero-padded)
            const_spec(N, n_vars),     # variables
            layer_spec(H2, H2),        # m1w  ([h_i | h_j] rows)
            layer_spec(C, H2),         # m1wc (constant-edge-feature rows)
            layer_spec(1, H2),         # m1b
            layer_spec(H2, H2),        # m2w  (block-diag gate/layer)
            layer_spec(1, H2),         # m2b
            layer_spec(3 * H, H2),     # u1w  ([h | gate-aggr | layer-aggr] rows)
            layer_spec(n_vars, H2),    # u1wv (variables rows -> rank-1 add)
            layer_spec(1, H2),         # u1b
            layer_spec(H2, H2),        # u2w  (block-diag)
            layer_spec(1, H2),         # u2b
        ],
        out_specs=pl.BlockSpec((N, H), lambda l: (0, 0)),
        compiler_params=pltpu.CompilerParams(dimension_semantics=("arbitrary",)),
        cost_estimate=cost,
    )(h0, gd, gs, aggm, nm, edge_const, variables,
      sp['m1w'], sp['m1wc'], sp['m1b'], sp['m2w'], sp['m2b'],
      sp['u1w'], sp['u1wv'], sp['u1b'], sp['u2w'], sp['u2b'])


def _conv_out_kernel(h_ref, w1_ref, b1_ref, w2_ref, b2_ref, ul_ref, dt_ref, o_ref):
    z = jnp.dot(h_ref[...], w1_ref[...], preferred_element_type=jnp.float32) + b1_ref[...]
    z = _swish(z)                                    # Swish between the two convs
    diff = jnp.dot(z, w2_ref[...], preferred_element_type=jnp.float32) + b2_ref[...]
    o_ref[...] = ul_ref[...] + dt_ref[...] * diff    # out = u[:, -1] + cumsum(dt) * diff


def conv_output(h, conv, u_last, dt_cum_pad, tw):
    n = h.shape[0]
    d_out = conv['w2m'].shape[1]                     # zero-padded to 128 lanes
    out = pl.pallas_call(
        _conv_out_kernel,
        out_shape=jax.ShapeDtypeStruct((n, d_out), jnp.float32),
    )(h, conv['w1m'], conv['b1m'].reshape(1, -1), conv['w2m'],
      conv['b2m'].reshape(1, -1), u_last, dt_cum_pad)
    return out[:, :tw]


# --------------------------------------------------------------------------
# Plain-JAX glue: graph-structure constant matrices (built once per forward)
# --------------------------------------------------------------------------
def build_graph_matrices(src, dst, batch, n_nodes, num_graphs):
    gd = jax.nn.one_hot(dst, n_nodes, dtype=jnp.float32)           # [E, N]
    gs = jax.nn.one_hot(src, n_nodes, dtype=jnp.float32)           # [E, N]
    deg = jnp.maximum(gd.sum(axis=0), 1.0)                         # in-degree
    aggm = gd.T / deg[:, None]                                     # [N, E] mean-aggr
    oh_b = jax.nn.one_hot(batch, num_graphs, dtype=jnp.float32)    # [N, G]
    cnt = jnp.maximum(oh_b.sum(axis=0), 1.0)
    nm = (oh_b / cnt[None, :]) @ oh_b.T                            # [N, N] graph-mean
    return gd, gs, aggm, nm


# --------------------------------------------------------------------------
# Parameter initialization (matches PyTorch module shapes / default inits)
# --------------------------------------------------------------------------
def linear_init(key, fan_in, fan_out):
    kw, kb = jax.random.split(key)
    bound = 1.0 / np.sqrt(fan_in)
    w = jax.random.uniform(kw, (fan_in, fan_out), jnp.float32, -bound, bound)
    b = jax.random.uniform(kb, (fan_out,), jnp.float32, -bound, bound)
    return w, b


def conv_init(key, c_in, c_out, k):
    kw, kb = jax.random.split(key)
    bound = 1.0 / np.sqrt(c_in * k)
    w = jax.random.uniform(kw, (c_out, c_in, k), jnp.float32, -bound, bound)
    b = jax.random.uniform(kb, (c_out,), jnp.float32, -bound, bound)
    return w, b


def gnn_layer_init(key, hidden, tw, n_vars):
    k1, k2, k3, k4 = jax.random.split(key, 4)
    return dict(
        m1=linear_init(k1, 2 * hidden + tw + 1 + n_vars, hidden),
        m2=linear_init(k2, hidden, hidden),
        u1=linear_init(k3, hidden + hidden + n_vars, hidden),
        u2=linear_init(k4, hidden, hidden),
    )


def _block_diag2(a, b):
    z1 = jnp.zeros((a.shape[0], b.shape[1]), jnp.float32)
    z2 = jnp.zeros((b.shape[0], a.shape[1]), jnp.float32)
    return jnp.concatenate(
        [jnp.concatenate([a, z1], axis=1), jnp.concatenate([z2, b], axis=1)], axis=0)


def fuse_and_stack_layers(gate_params, layer_params, hidden):
    """Fuse every (gate GNN, layer GNN) pair into 2H-wide matmul weights and stack
    all layers on a leading axis (consumed by the fused kernel's layer grid).

    Column layout of every fused activation: [0:H] = gate net, [H:2H] = layer net.
    """
    H = hidden
    acc = {k: [] for k in ('m1w', 'm1wc', 'm1b', 'm2w', 'm2b',
                           'u1w', 'u1wv', 'u1b', 'u2w', 'u2b')}
    for gp, lp in zip(gate_params, layer_params):
        # message net 1: shared edge input -> concat along the output axis; split
        # the [h_i | h_j] rows from the layer-invariant edge-feature rows.
        gw, gb = gp['m1']; lw, lb = lp['m1']
        acc['m1w'].append(jnp.concatenate([gw[:2 * H], lw[:2 * H]], axis=1))
        wc = jnp.concatenate([gw[2 * H:], lw[2 * H:]], axis=1)     # [TW+1+n_vars, 2H]
        c_pad = (-wc.shape[0]) % 8                                 # sublane alignment
        acc['m1wc'].append(jnp.pad(wc, ((0, c_pad), (0, 0))))
        acc['m1b'].append(jnp.concatenate([gb, lb])[None])
        # message net 2: block diagonal keeps gate / layer separate
        gw, gb = gp['m2']; lw, lb = lp['m2']
        acc['m2w'].append(_block_diag2(gw, lw))
        acc['m2b'].append(jnp.concatenate([gb, lb])[None])
        # update net 1: rows = [h (H) | gate-aggr (H) | layer-aggr (H)], vars split off
        gw, gb = gp['u1']; lw, lb = lp['u1']
        zeros = jnp.zeros((H, H), jnp.float32)
        acc['u1w'].append(jnp.concatenate([
            jnp.concatenate([gw[:H], lw[:H]], axis=1),
            jnp.concatenate([gw[H:2 * H], zeros], axis=1),
            jnp.concatenate([zeros, lw[H:2 * H]], axis=1)], axis=0))
        acc['u1wv'].append(jnp.concatenate([gw[2 * H:], lw[2 * H:]], axis=1))
        acc['u1b'].append(jnp.concatenate([gb, lb])[None])
        # update net 2 (no activation): block diagonal
        gw, gb = gp['u2']; lw, lb = lp['u2']
        acc['u2w'].append(_block_diag2(gw, lw))
        acc['u2b'].append(jnp.concatenate([gb, lb])[None])
    return {k: jnp.stack(v, axis=0) for k, v in acc.items()}


def build_conv_matrices(w1, b1, w2, b2, length_in, tw, out_pad=128):
    """Lower Conv1d(1,C1,K1,stride=s1) -> Swish -> Conv1d(C1,1,K2) to im2col
    matmuls; the final output is zero-padded to `out_pad` lanes (dense store)."""
    c1, _, k1 = w1.shape
    s1 = {20: 4, 25: 3, 50: 2}[tw]
    p1 = (length_in - k1) // s1 + 1
    _, _, k2 = w2.shape
    p2 = p1 - k2 + 1
    assert p2 == tw, (p2, tw)
    W1m = np.zeros((length_in, p1 * c1), np.float32)
    for p in range(p1):
        for k in range(k1):
            W1m[p * s1 + k, p * c1:(p + 1) * c1] = w1[:, 0, k]
    b1m = np.tile(np.asarray(b1, np.float32), p1)
    W2m = np.zeros((p1 * c1, out_pad), np.float32)
    for p in range(p2):
        for k in range(k2):
            W2m[(p + k) * c1:(p + k + 1) * c1, p] = w2[0, :, k]
    b2m = np.zeros((out_pad,), np.float32)
    b2m[:p2] = float(b2[0])
    return jnp.asarray(W1m), jnp.asarray(b1m), jnp.asarray(W2m), jnp.asarray(b2m)


# --------------------------------------------------------------------------
# Full forward pass of MP_PDE_SolverGated (3 pallas_call launches)
# --------------------------------------------------------------------------
def forward(params, u, pos, src, dst, batch, num_graphs, pde):
    N, TW = u.shape
    pos_x = pos[:, 1:2] / pde['L']
    pos_t = pos[:, 0:1] / pde['tmax']
    variables = pos_t                    # eq_variables = {} -> variables = pos_t only

    # embedding_mlp: Linear(TW+2, H) -> Swish -> Linear(H, H) -> Swish
    node_input = jnp.concatenate([u, pos_x, variables], axis=-1)
    emb = params['embedding']
    h0 = mlp2(node_input, *emb['l1'], *emb['l2'], last_swish=True)

    # TODO(synk): irregular edge indexing has no direct Pallas op; it is lowered
    # to tiny constant one-hot / averaging matrices (built once here in plain
    # JAX) that the fused kernel multiplies on the MXU.
    gd, gs, aggm, nm = build_graph_matrices(src, dst, batch, N, num_graphs)
    edge_const = jnp.concatenate(
        [u[dst] - u[src], pos_x[dst] - pos_x[src], variables[dst]], axis=-1)
    c_tot = params['stacked']['m1wc'].shape[1]
    edge_const = jnp.pad(edge_const, ((0, 0), (0, c_tot - edge_const.shape[1])))

    # all gated GNN layers fused into one kernel; h stays resident in VMEM
    h = gated_layers(h0, gd, gs, aggm, nm, edge_const, variables, params['stacked'])

    # output_mlp (Conv1d stack) + final  u[:, -1] + cumsum(dt) * diff  epilogue
    return conv_output(h, params['conv'], u[:, TW - 1:TW], params['dt_cum'], TW)


# --------------------------------------------------------------------------
if __name__ == "__main__":
    TW = 25               # time_window (must be 20 / 25 / 50)
    H = 128               # hidden_features
    HIDDEN_LAYERS = 6
    N_PER_GRAPH = 16
    NUM_GRAPHS = 2
    N = N_PER_GRAPH * NUM_GRAPHS
    N_VARS = 1            # len(eq_variables) + 1 with eq_variables = {}
    pde = dict(L=16.0, tmax=4.0, dt=0.25)

    key = jax.random.PRNGKey(0)
    keys = jax.random.split(key, 6)

    # ---- parameters ----
    gate_keys = jax.random.split(keys[0], HIDDEN_LAYERS)
    layer_keys = jax.random.split(keys[1], HIDDEN_LAYERS)
    gate_params = [gnn_layer_init(k, H, TW, N_VARS) for k in gate_keys]
    layer_params = [gnn_layer_init(k, H, TW, N_VARS) for k in layer_keys]
    stacked = fuse_and_stack_layers(gate_params, layer_params, H)

    ek1, ek2 = jax.random.split(keys[2])
    embedding = dict(l1=linear_init(ek1, TW + 2, H),      # TW + 2 + len(eq_vars) = 27
                     l2=linear_init(ek2, H, H))

    ck1, ck2 = jax.random.split(keys[3])
    cw1, cb1 = conv_init(ck1, 1, 8, 16)      # Conv1d(1, 8, 16, stride=3)
    cw2, cb2 = conv_init(ck2, 8, 1, 14)      # Conv1d(8, 1, 14, stride=1)
    w1m, b1m, w2m, b2m = build_conv_matrices(
        np.asarray(cw1), np.asarray(cb1), np.asarray(cw2), np.asarray(cb2), H, TW)
    dt_cum = np.zeros((1, w2m.shape[1]), np.float32)
    dt_cum[0, :TW] = pde['dt'] * np.arange(1, TW + 1, dtype=np.float32)

    params = dict(stacked=stacked, embedding=embedding,
                  conv=dict(w1m=w1m, b1m=b1m, w2m=w2m, b2m=b2m),
                  dt_cum=jnp.asarray(dt_cum))

    # ---- inputs: two cyclic 1-D grids (periodic boundary), E = 64 edges ----
    ku, kt = jax.random.split(keys[4])
    u = jax.random.normal(ku, (N, TW), jnp.float32)
    pos_t = jax.random.uniform(kt, (N, 1), jnp.float32, 0.0, pde['tmax'])
    pos_x = jnp.tile(jnp.linspace(0.0, pde['L'], N_PER_GRAPH,
                                  dtype=jnp.float32)[:, None], (NUM_GRAPHS, 1))
    pos = jnp.concatenate([pos_t, pos_x], axis=-1)       # [N, 2]: (t, x)
    batch = jnp.repeat(jnp.arange(NUM_GRAPHS, dtype=jnp.int32), N_PER_GRAPH)

    src_list, dst_list = [], []
    for g in range(NUM_GRAPHS):
        off = g * N_PER_GRAPH
        for i in range(N_PER_GRAPH):
            j = (i + 1) % N_PER_GRAPH
            src_list += [off + i, off + j]
            dst_list += [off + j, off + i]
    src = jnp.asarray(src_list, jnp.int32)
    dst = jnp.asarray(dst_list, jnp.int32)

    out = forward(params, u, pos, src, dst, batch, NUM_GRAPHS, pde)
    out = jax.block_until_ready(out)
    assert out.shape == (N, TW) and out.dtype == jnp.float32
    assert bool(jnp.all(jnp.isfinite(out)))
    print("KERNEL_OK")
</pallas_src>

<mosaic_0001>
module attributes {stable_mosaic.version = 11 : i64} {
  func.func @_mlp2_kernel(%arg0: memref<32x27xf32, #tpu.memory_space<vmem>>, %arg1: memref<27x128xf32, #tpu.memory_space<vmem>>, %arg2: memref<1x128xf32, #tpu.memory_space<vmem>>, %arg3: memref<128x128xf32, #tpu.memory_space<vmem>>, %arg4: memref<1x128xf32, #tpu.memory_space<vmem>>, %arg5: memref<32x128xf32, #tpu.memory_space<vmem>>) attributes {dimension_semantics = [], scalar_prefetch = 0 : i64, scratch_operands = 0 : i64, tpu.core_type = #tpu.core_type<tc>} {
    %c0 = arith.constant 0 : index
    %c0_0 = arith.constant 0 : index
    %0 = vector.load %arg0[%c0, %c0_0] : memref<32x27xf32, #tpu.memory_space<vmem>>, vector<32x27xf32>
    %c0_1 = arith.constant 0 : index
    %c0_2 = arith.constant 0 : index
    %1 = vector.load %arg1[%c0_1, %c0_2] : memref<27x128xf32, #tpu.memory_space<vmem>>, vector<27x128xf32>
    %cst = arith.constant dense<0.000000e+00> : vector<32x128xf32>
    %2 = tpu.matmul %0, %1, %cst {dimension_numbers = #tpu.dot_dimension_numbers<[1], [0], [0], [1], [0, 0, 1, 1], [], []>} : vector<32x27xf32>, vector<27x128xf32>, vector<32x128xf32> -> vector<32x128xf32>
    %c0_3 = arith.constant 0 : index
    %c0_4 = arith.constant 0 : index
    %3 = vector.load %arg2[%c0_3, %c0_4] : memref<1x128xf32, #tpu.memory_space<vmem>>, vector<1x128xf32>
    %4 = vector.broadcast %3 : vector<1x128xf32> to vector<32x128xf32>
    %5 = arith.addf %2, %4 : vector<32x128xf32>
    %6 = math.absf %5 : vector<32x128xf32>
    %cst_5 = arith.constant 0.000000e+00 : f32
    %7 = vector.broadcast %cst_5 : f32 to vector<32x128xf32>
    %8 = arith.subf %7, %6 : vector<32x128xf32>
    %9 = math.exp %8 : vector<32x128xf32>
    %cst_6 = arith.constant 1.000000e+00 : f32
    %10 = vector.broadcast %cst_6 : f32 to vector<32x128xf32>
    %11 = arith.addf %10, %9 : vector<32x128xf32>
    %cst_7 = arith.constant 1.000000e+00 : f32
    %12 = vector.broadcast %cst_7 : f32 to vector<32x128xf32>
    %13 = arith.divf %12, %11 : vector<32x128xf32>
    %cst_8 = arith.constant 0.000000e+00 : f32
    %14 = vector.broadcast %cst_8 : f32 to vector<32x128xf32>
    %15 = arith.cmpf oge, %5, %14 : vector<32x128xf32>
    %16 = arith.mulf %9, %13 : vector<32x128xf32>
    %17 = arith.select %15, %13, %16 : vector<32x128xi1>, vector<32x128xf32>
    %18 = arith.mulf %5, %17 : vector<32x128xf32>
    %c0_9 = arith.constant 0 : index
    %c0_10 = arith.constant 0 : index
    %19 = vector.load %arg3[%c0_9, %c0_10] : memref<128x128xf32, #tpu.memory_space<vmem>>, vector<128x128xf32>
    %cst_11 = arith.constant dense<0.000000e+00> : vector<32x128xf32>
    %20 = tpu.matmul %18, %19, %cst_11 {dimension_numbers = #tpu.dot_dimension_numbers<[1], [0], [0], [1], [0, 0, 1, 1], [], []>} : vector<32x128xf32>, vector<128x128xf32>, vector<32x128xf32> -> vector<32x128xf32>
    %c0_12 = arith.constant 0 : index
    %c0_13 = arith.constant 0 : index
    %21 = vector.load %arg4[%c0_12, %c0_13] : memref<1x128xf32, #tpu.memory_space<vmem>>, vector<1x128xf32>
    %22 = vector.broadcast %21 : vector<1x128xf32> to vector<32x128xf32>
    %23 = arith.addf %20, %22 : vector<32x128xf32>
    %24 = math.absf %23 : vector<32x128xf32>
    %cst_14 = arith.constant 0.000000e+00 : f32
    %25 = vector.broadcast %cst_14 : f32 to vector<32x128xf32>
    %26 = arith.subf %25, %24 : vector<32x128xf32>
    %27 = math.exp %26 : vector<32x128xf32>
    %cst_15 = arith.constant 1.000000e+00 : f32
    %28 = vector.broadcast %cst_15 : f32 to vector<32x128xf32>
    %29 = arith.addf %28, %27 : vector<32x128xf32>
    %cst_16 = arith.constant 1.000000e+00 : f32
    %30 = vector.broadcast %cst_16 : f32 to vector<32x128xf32>
    %31 = arith.divf %30, %29 : vector<32x128xf32>
    %cst_17 = arith.constant 0.000000e+00 : f32
    %32 = vector.broadcast %cst_17 : f32 to vector<32x128xf32>
    %33 = arith.cmpf oge, %23, %32 : vector<32x128xf32>
    %34 = arith.mulf %27, %31 : vector<32x128xf32>
    %35 = arith.select %33, %31, %34 : vector<32x128xi1>, vector<32x128xf32>
    %36 = arith.mulf %23, %35 : vector<32x128xf32>
    %c0_18 = arith.constant 0 : index
    %c0_19 = arith.constant 0 : index
    %37 = vector.load %arg5[%c0_18, %c0_19] : memref<32x128xf32, #tpu.memory_space<vmem>>, vector<32x128xf32>
    tpu.vector_store %arg5[%c0_18, %c0_19], %36 {strides = array<i32>} : memref<32x128xf32, #tpu.memory_space<vmem>>, vector<32x128xf32>,
    return
  }
}

</mosaic_0001>

<bundles_post_ra>
// kernel: tpu_custom_call.1
= control target key start
LH: loop header
LB: loop body
LE: loop exit
PB: predicated region body
PF: predicated region fallthrough
CT: control target
= control target key end

     0   :  { %10 = vsyncpa [#allocation3], 0  ;;  %s773_s0 = inlined_call_operand.hbm [shape: f32[32,27], index: 0, kind: input, shape index: {}]   ;;  %s774_s1 = inlined_call_operand.hbm [shape: f32[27,128], index: 1, kind: input, shape index: {}]   ;;  %s775_s2 = inlined_call_operand.vmem [shape: f32[1,128], index: 2, kind: input, shape index: {}]   ;;  %s776_s3 = inlined_call_operand.hbm [shape: f32[128,128], index: 3, kind: input, shape index: {}]   ;;  %s777_s4 = inlined_call_operand.vmem [shape: f32[1,128], index: 4, kind: input, shape index: {}]   ;;  %s778_s5 = inlined_call_operand.hbm [shape: f32[32,128], index: 5, kind: output, shape index: {}]  }
   0x1   :  { %11 = vsyncpa [#allocation6], 0 }
   0x2   :  { %12 = vsyncpa [#allocation4], 0  ;;  %s659_s18 = smov [#allocation5]   ;;  %s660_s20 = smov [#allocation2]  }
   0x3   :  { %s30_s19 = sshll.u32 %s659_s18, 4  ;;  %s18_s21 = sshll.u32 %s660_s20, 4  ;;  %s31_s19 = int_to_ptr.vmem [resolvable:$true] %s30_s19  ;;  %s696_s21 = int_to_ptr.vmem [resolvable:$true] %s18_s21 }
   0x4   :  { %s565_s24 = scalar_lea.hbm %s774_s1, 512 }
   0x5   :  { %p566_p0 = scmp.ne.s32.totalorder %s774_s1, %s565_s24  ;;  %p569_p1 = scmp.lt.u32.totalorder %s565_s24, %s774_s1 }
   0x7   :  { %p571_p2 = pnand %p569_p1, %p566_p0 }
   0x9   :  { %574 = shalt.err (!%p571_p2)
}
   0xa   :  { %s575_s29 = scalar_lea.vmem %s31_s19, 512  ;;  %p580_p4 = scmp.lt.s32.totalorder %s31_s19, %s31_s19 }
   0xb   :  { %p576_p3 = scmp.ne.s32.totalorder %s31_s19, %s575_s29  ;;  %p581_p5 = scmp.lt.s32.totalorder %s575_s29, %s575_s29 }
   0xd   :  { %p582_p6 = por %p581_p5, %p580_p4 }
   0xf   :  { %p583_p7 = pnand %p582_p6, %p576_p3 }
  0x11   :  { %586 = shalt.err (!%p583_p7)
}
  0x12   :  { %s661_s30 = smov 128   ;;  %s662_s6 = smov 8  }
  0x13   :  { %36 = dma.hbm_to_vmem [thread:$0]  %s774_s1, 512, %s31_s19, [#allocation6], %s661_s30, %s661_s30, %s662_s6  }
  0x14   :  { %s587_s11 = scalar_lea.hbm %s773_s0, 512 }
  0x15   :  { %p588_p8 = scmp.ne.s32.totalorder %s773_s0, %s587_s11  ;;  %p591_p9 = scmp.lt.u32.totalorder %s587_s11, %s773_s0 }
  0x17   :  { %p593_p10 = pnand %p591_p9, %p588_p8 }
  0x19   :  { %596 = shalt.err (!%p593_p10)
}
  0x1a   :  { %s597_s16 = scalar_lea.vmem %s696_s21, 512  ;;  %p602_p12 = scmp.lt.s32.totalorder %s696_s21, %s696_s21 }
  0x1b   :  { %p598_p11 = scmp.ne.s32.totalorder %s696_s21, %s597_s16  ;;  %p603_p13 = scmp.lt.s32.totalorder %s597_s16, %s597_s16 }
  0x1d   :  { %p604_p0 = por %p603_p13, %p602_p12 }
  0x1f   :  { %p605_p1 = pnand %p604_p0, %p598_p11 }
  0x21   :  { %608 = shalt.err (!%p605_p1)
}
  0x22   :  { %24 = dma.hbm_to_vmem [thread:$0]  %s773_s0, 512, %s696_s21, [#allocation3], %s661_s30, %s661_s30, %s662_s6  }
  0x23   :  { %s663_s18 = smov [#allocation7]   ;;  %s609_s23 = scalar_lea.hbm %s776_s3, 2048 }
  0x24   :  { %s44_s19 = sshll.u32 %s663_s18, 4  ;;  %p610_p2 = scmp.ne.s32.totalorder %s776_s3, %s609_s23  ;;  %s45_s19 = int_to_ptr.vmem [resolvable:$true] %s44_s19 }
  0x25   :  { %p613_p3 = scmp.lt.u32.totalorder %s609_s23, %s776_s3 }
  0x27   :  { %p615_p4 = pnand %p613_p3, %p610_p2 }
  0x29   :  { %618 = shalt.err (!%p615_p4)
}
  0x2a   :  { %s619_s28 = scalar_lea.vmem %s45_s19, 2048  ;;  %p624_p6 = scmp.lt.s32.totalorder %s45_s19, %s45_s19 }
  0x2b   :  { %p620_p5 = scmp.ne.s32.totalorder %s45_s19, %s619_s28  ;;  %p625_p7 = scmp.lt.s32.totalorder %s619_s28, %s619_s28 }
  0x2d   :  { %p626_p8 = por %p625_p7, %p624_p6 }
  0x2f   :  { %p627_p9 = pnand %p626_p8, %p620_p5 }
  0x31   :  { %630 = shalt.err (!%p627_p9)
}
  0x32   :  { %50 = dma.hbm_to_vmem [thread:$0]  %s776_s3, 2048, %s45_s19, [#allocation6], %s661_s30, %s661_s30, %s662_s6  }
  0x33   :  { %653 = dma.done.wait [#allocation3], 512  }
  0x34   :  { %654 = vsyncadd [#allocation3], 4294966784 }
  0x35   :  { %655 = dma.done.wait [#allocation6], 2560  }
  0x36   :  { %656 = vsyncadd [#allocation6], 4294964736  ;;  %vm90_vm0 = vcmask 1042432   ;;  %vm77_vm1 = vcmask 220160   ;;  %v66_v0 = vld [vmem:[#allocation5] sm:$0xff]  ;;  %v67_v1 = vld [vmem:[#allocation5 + $0x8] sm:$0xff] }
  0x37   :  { %v68_v2 = vld [vmem:[#allocation5 + $0x10] sm:$0xff]  ;;  %v484_v3 = vpack.c.bf16 %v67_v1, %v66_v0  ;;  %v69_v4 = vld [vmem:[#allocation5 + $0x18] sm:$0x7]  ;;  %v62_v5 = vld [vmem:[#allocation2] sm:$0xff]  ;;  %vm664_vm2 = vmmov 1  }
  0x38   :  { %v488_v6 = vpack.c.bf16 %v69_v4, %v68_v2  ;;  %vm489_vm3 = vmpackc.low %vm90_vm0, %vm664_vm2  ;;  %440 = vmatprep.mubr.msk.f32.mxu0 %vm77_vm1, %v62_v5  ;;  %v63_v7 = vld [vmem:[#allocation2 + $0x8] sm:$0xff]  ;;  %v64_v8 = vld [vmem:[#allocation2 + $0x10] sm:$0xff] }
  0x39   :  { %485 = vmatprep.subr.bf16.mxu0 %v484_v3  ;;  %v65_v9 = vld [vmem:[#allocation2 + $0x18] sm:$0xff]  ;;  %v223_v10 = vld [vmem:[#allocation7] sm:$0xff]  ;;  %v224_v11 = vld [vmem:[#allocation7 + $0x8] sm:$0xff] }
  0x3a   :  { %487 = vmatpush3.bf16.msra.mxu0 %v484_v3  ;;  %v494_v12 = vpack.c.bf16 %v224_v11, %v223_v10  ;;  %v225_v13 = vld [vmem:[#allocation7 + $0x10] sm:$0xff]  ;;  %v226_v14 = vld [vmem:[#allocation7 + $0x18] sm:$0xff]  ;;  %v227_v16 = vld [vmem:[#allocation7 + $0x20] sm:$0xff] }
  0x3b   :  { %490 = vmatprep.subr.msk.bf16.mxu0 %vm489_vm3, %v488_v6  ;;  %v498_v15 = vpack.c.bf16 %v226_v14, %v225_v13  ;;  %v228_v17 = vld [vmem:[#allocation7 + $0x28] sm:$0xff]  ;;  %v229_v19 = vld [vmem:[#allocation7 + $0x30] sm:$0xff]  ;;  %v230_v20 = vld [vmem:[#allocation7 + $0x38] sm:$0xff] }
  0x3c   :  { %495 = vmatprep.subr.bf16.mxu1 %v494_v12  ;;  %v502_v18 = vpack.c.bf16 %v228_v17, %v227_v16  ;;  %v506_v21 = vpack.c.bf16 %v230_v20, %v229_v19  ;;  %v231_v22 = vld [vmem:[#allocation7 + $0x40] sm:$0xff]  ;;  %v232_v23 = vld [vmem:[#allocation7 + $0x48] sm:$0xff]  ;;  %v233_v25 = vld [vmem:[#allocation7 + $0x50] sm:$0xff] }
  0x3d   :  { %497 = vmatpush3.bf16.msra.mxu1 %v494_v12  ;;  %v510_v24 = vpack.c.bf16 %v232_v23, %v231_v22  ;;  %v234_v26 = vld [vmem:[#allocation7 + $0x58] sm:$0xff]  ;;  %v235_v28 = vld [vmem:[#allocation7 + $0x60] sm:$0xff]  ;;  %v236_v29 = vld [vmem:[#allocation7 + $0x68] sm:$0xff] }
  0x3e   :  { %493 = vmatpush3.bf16.msk.msra.mxu0 %vm489_vm3, %v488_v6  ;;  %499 = vmatprep.subr.bf16.mxu1 %v498_v15  ;;  %v514_v27 = vpack.c.bf16 %v234_v26, %v233_v25  ;;  %v237_v30 = vld [vmem:[#allocation7 + $0x70] sm:$0xff]  ;;  %v518_v31 = vpack.c.bf16 %v236_v29, %v235_v28  ;;  %v238_v32 = vld [vmem:[#allocation7 + $0x78] sm:$0xff]  ;;  %v397_v34 = vld [vmem:[%s775_s2] ss:$0 sm:$0xff] }
  0x3f   :  { %v522_v33 = vpack.c.bf16 %v238_v32, %v237_v30 }
  0x41   :  { %441 = vmatmul.mubr.msk.f32.vlgmr.msra.gmra.mrb[0].mxu0 %vm77_vm1, %v63_v7  ;;  %501 = vmatpush3.bf16.msra.mxu1 %v498_v15  ;;  %v403_v15 = vld [vmem:[%s777_s4] ss:$0 sm:$0xff]  ;;  %s665_s4 = smov [#allocation8]  }
  0x42   :  { %443 = vmatprep.mubr.msk.f32.mxu0 %vm77_vm1, %v64_v8  ;;  %503 = vmatprep.subr.bf16.mxu1 %v502_v18  ;;  %s384_s8 = sshll.u32 %s665_s4, 4  ;;  %s385_s8 = int_to_ptr.vmem [resolvable:$true] %s384_s8 }
  0x43   :  { %s631_s9 = scalar_lea.vmem %s385_s8, 512  ;;  %p636_p11 = scmp.lt.s32.totalorder %s385_s8, %s385_s8 }
  0x44   :  { %p632_p10 = scmp.ne.s32.totalorder %s385_s8, %s631_s9  ;;  %p637_p12 = scmp.lt.s32.totalorder %s631_s9, %s631_s9 }
  0x45   :  { %444 = vmatmul.mubr.msk.f32.gmra.mrb[2].mxu0 %vm77_vm1, %v65_v9  ;;  %505 = vmatpush3.bf16.msra.mxu1 %v502_v18 }
  0x46   :  { %507 = vmatprep.subr.bf16.mxu1 %v506_v21  ;;  %p638_p13 = por %p637_p12, %p636_p11 }
  0x48   :  { %p639_p0 = pnand %p638_p13, %p632_p10 }
  0x49   :  { %509 = vmatpush3.bf16.msra.mxu1 %v506_v21 }
  0x4a   :  { %511 = vmatprep.subr.bf16.mxu1 %v510_v24 }
  0x4d   :  { %513 = vmatpush3.bf16.msra.mxu1 %v510_v24 }
  0x4e   :  { %515 = vmatprep.subr.bf16.mxu1 %v514_v27 }
  0x51   :  { %517 = vmatpush3.bf16.msra.mxu1 %v514_v27 }
  0x52   :  { %519 = vmatprep.subr.bf16.mxu1 %v518_v31 }
  0x55   :  { %521 = vmatpush3.bf16.msra.mxu1 %v518_v31 }
  0x56   :  { %523 = vmatprep.subr.bf16.mxu1 %v522_v33 }
  0x59   :  { %525 = vmatpush3.bf16.msra.mxu1 %v522_v33 }
 0x114   :  { %v442_v35 = vpop.f32.mrb[0].mxu0 }
 0x115   :  { %v166_v36 = vadd.f32 %v442_v35, %v397_v34  ;;  %v160_v37 = vpop.f32.mrb[1].mxu0 }
 0x116   :  { %v161_v38 = vadd.f32 %v397_v34, %v160_v37 }
 0x117   :  { %v180_v39 = vand.u32 2147483647, %v166_v36  ;;  %vm208_vm4 = vcmp.ge.f32.partialorder %v166_v36, 0.0 }
 0x118   :  { %v179_v40 = vand.u32 2147483647, %v161_v38  ;;  %v445_v41 = vpop.f32.mrb[2].mxu0  ;;  %vm207_vm5 = vcmp.ge.f32.partialorder %v161_v38, 0.0 }
 0x119   :  { %v184_v42 = vsub.f32 0.0, %v180_v39  ;;  %v176_v43 = vadd.f32 %v445_v41, %v397_v34  ;;  %v170_v44 = vpop.f32.mrb[3].mxu0 }
 0x11a   :  { %v183_v45 = vsub.f32 0.0, %v179_v40  ;;  %v171_v46 = vadd.f32 %v397_v34, %v170_v44 }
 0x11b   :  { %v189_v47 = vmul.f32 1.442695, %v184_v42  ;;  %v182_v48 = vand.u32 2147483647, %v176_v43  ;;  %vm210_vm6 = vcmp.ge.f32.partialorder %v176_v43, 0.0 }
 0x11c   :  { %v187_v49 = vmul.f32 1.442695, %v183_v45  ;;  %v181_v50 = vand.u32 2147483647, %v171_v46  ;;  %vm209_vm7 = vcmp.ge.f32.partialorder %v171_v46, 0.0 }
 0x11d   :  { %533 = vpow2.f32 %v189_v47  ;;  %v186_v51 = vsub.f32 0.0, %v182_v48 }
 0x11e   :  { %535 = vpow2.f32 %v187_v49  ;;  %v185_v52 = vsub.f32 0.0, %v181_v50 }
 0x11f   :  { %v193_v53 = vmul.f32 1.442695, %v186_v51 }
 0x120   :  { %v191_v54 = vmul.f32 1.442695, %v185_v52 }
 0x121   :  { %537 = vpow2.f32 %v193_v53 }
 0x122   :  { %539 = vpow2.f32 %v191_v54 }
 0x127   :  { %v534_v55 = vpop.eup %533 }
 0x128   :  { %v536_v56 = vpop.eup %535  ;;  %v196_v57 = vadd.f32 1.0, %v534_v55 }
 0x129   :  { %v195_v58 = vadd.f32 1.0, %v536_v56 }
 0x12a   :  { %541 = vrcp.f32 %v196_v57 }
 0x12b   :  { %v538_v59 = vpop.eup %537  ;;  %543 = vrcp.f32 %v195_v58 }
 0x12c   :  { %v540_v60 = vpop.eup %539  ;;  %v198_v61 = vadd.f32 1.0, %v538_v59 }
 0x12d   :  { %v197_v62 = vadd.f32 1.0, %v540_v60 }
 0x12e   :  { %545 = vrcp.f32 %v198_v61 }
 0x12f   :  { %547 = vrcp.f32 %v197_v62 }
 0x134   :  { %v542_v63 = vpop.eup %541 }
 0x135   :  { %v544_v0 = vpop.eup %543  ;;  %v212_v1 = vmul.f32 %v542_v63, %v534_v55 }
 0x136   :  { %v211_v2 = vmul.f32 %v544_v0, %v536_v56 }
 0x137   :  { %v216_v3 = vsel %vm208_vm4, %v542_v63, %v212_v1 }
 0x138   :  { %v546_v4 = vpop.eup %545  ;;  %v215_v5 = vsel %vm207_vm5, %v544_v0, %v211_v2  ;;  %v220_v9 = vmul.f32 %v216_v3, %v166_v36 }
 0x139   :  { %v548_v6 = vpop.eup %547  ;;  %v219_v7 = vmul.f32 %v215_v5, %v161_v38  ;;  %v214_v8 = vmul.f32 %v546_v4, %v538_v59 }
 0x13a   :  { %v213_v10 = vmul.f32 %v548_v6, %v540_v60 }
 0x13b   :  { %478 = vmatprep.mubr.f32.mxu1 %v219_v7  ;;  %v218_v11 = vsel %vm210_vm6, %v546_v4, %v214_v8 }
 0x13c   :  { %479 = vmatmul.mubr.f32.vlgmr.msra.gmra.mrb[0].mxu1 %v220_v9  ;;  %v217_v12 = vsel %vm209_vm7, %v548_v6, %v213_v10  ;;  %v222_v14 = vmul.f32 %v218_v11, %v176_v43 }
 0x13d   :  { %v221_v13 = vmul.f32 %v217_v12, %v171_v46 }
 0x13f   :  { %481 = vmatprep.mubr.f32.mxu1 %v221_v13 }
 0x140   :  { %482 = vmatmul.mubr.f32.gmra.mrb[2].mxu1 %v222_v14 }
 0x20f   :  { %v480_v16 = vpop.f32.mrb[0].mxu1 }
 0x210   :  { %v318_v17 = vadd.f32 %v480_v16, %v403_v15  ;;  %v312_v18 = vpop.f32.mrb[1].mxu1 }
 0x211   :  { %v313_v19 = vadd.f32 %v403_v15, %v312_v18 }
 0x212   :  { %v332_v20 = vand.u32 2147483647, %v318_v17  ;;  %vm360_vm8 = vcmp.ge.f32.partialorder %v318_v17, 0.0 }
 0x213   :  { %v331_v21 = vand.u32 2147483647, %v313_v19  ;;  %v483_v22 = vpop.f32.mrb[2].mxu1  ;;  %vm359_vm9 = vcmp.ge.f32.partialorder %v313_v19, 0.0 }
 0x214   :  { %v336_v23 = vsub.f32 0.0, %v332_v20  ;;  %v328_v24 = vadd.f32 %v483_v22, %v403_v15  ;;  %v322_v25 = vpop.f32.mrb[3].mxu1 }
 0x215   :  { %v335_v26 = vsub.f32 0.0, %v331_v21  ;;  %v323_v27 = vadd.f32 %v403_v15, %v322_v25 }
 0x216   :  { %v341_v28 = vmul.f32 1.442695, %v336_v23  ;;  %v334_v29 = vand.u32 2147483647, %v328_v24  ;;  %vm362_vm10 = vcmp.ge.f32.partialorder %v328_v24, 0.0 }
 0x217   :  { %v339_v30 = vmul.f32 1.442695, %v335_v26  ;;  %v333_v31 = vand.u32 2147483647, %v323_v27  ;;  %vm361_vm11 = vcmp.ge.f32.partialorder %v323_v27, 0.0 }
 0x218   :  { %549 = vpow2.f32 %v341_v28  ;;  %v338_v32 = vsub.f32 0.0, %v334_v29 }
 0x219   :  { %551 = vpow2.f32 %v339_v30  ;;  %v337_v33 = vsub.f32 0.0, %v333_v31 }
 0x21a   :  { %v345_v34 = vmul.f32 1.442695, %v338_v32 }
 0x21b   :  { %v343_v35 = vmul.f32 1.442695, %v337_v33 }
 0x21c   :  { %553 = vpow2.f32 %v345_v34 }
 0x21d   :  { %555 = vpow2.f32 %v343_v35 }
 0x222   :  { %v550_v36 = vpop.eup %549 }
 0x223   :  { %v552_v37 = vpop.eup %551  ;;  %v348_v38 = vadd.f32 1.0, %v550_v36 }
 0x224   :  { %v347_v39 = vadd.f32 1.0, %v552_v37 }
 0x225   :  { %557 = vrcp.f32 %v348_v38 }
 0x226   :  { %v554_v40 = vpop.eup %553  ;;  %559 = vrcp.f32 %v347_v39 }
 0x227   :  { %v556_v41 = vpop.eup %555  ;;  %v350_v42 = vadd.f32 1.0, %v554_v40 }
 0x228   :  { %v349_v43 = vadd.f32 1.0, %v556_v41 }
 0x229   :  { %561 = vrcp.f32 %v350_v42 }
 0x22a   :  { %563 = vrcp.f32 %v349_v43 }
 0x22f   :  { %v558_v44 = vpop.eup %557 }
 0x230   :  { %v560_v45 = vpop.eup %559  ;;  %v364_v46 = vmul.f32 %v558_v44, %v550_v36 }
 0x231   :  { %v363_v47 = vmul.f32 %v560_v45, %v552_v37 }
 0x232   :  { %v368_v48 = vsel %vm360_vm8, %v558_v44, %v364_v46 }
 0x233   :  { %v562_v49 = vpop.eup %561  ;;  %v372_v50 = vmul.f32 %v368_v48, %v318_v17  ;;  %v367_v51 = vsel %vm359_vm9, %v560_v45, %v363_v47 }
 0x234   :  { %v564_v52 = vpop.eup %563  ;;  %v371_v53 = vmul.f32 %v367_v51, %v313_v19  ;;  %v366_v54 = vmul.f32 %v562_v49, %v554_v40 }
 0x235   :  { %376 = vst [vmem:[#allocation8 + $0x8] sm:$0xff] %v372_v50  ;;  %v365_v55 = vmul.f32 %v564_v52, %v556_v41 }
 0x236   :  { %375 = vst [vmem:[#allocation8] sm:$0xff] %v371_v53  ;;  %v370_v56 = vsel %vm362_vm10, %v562_v49, %v366_v54 }
 0x237   :  { %v374_v57 = vmul.f32 %v370_v56, %v328_v24  ;;  %v369_v58 = vsel %vm361_vm11, %v564_v52, %v365_v55 }
 0x238   :  { %v373_v59 = vmul.f32 %v369_v58, %v323_v27 }
 0x239   :  { %378 = vst [vmem:[#allocation8 + $0x18] sm:$0xff] %v374_v57 }
 0x23a   :  { %377 = vst [vmem:[#allocation8 + $0x10] sm:$0xff] %v373_v59 }
 0x23b   :  { %642 = shalt.err (!%p639_p0)
}
 0x23c   :  { %s643_s12 = scalar_lea.hbm %s778_s5, 512 }
 0x23d   :  { %p644_p1 = scmp.ne.s32.totalorder %s778_s5, %s643_s12  ;;  %p647_p2 = scmp.lt.u32.totalorder %s643_s12, %s778_s5 }
 0x23f   :  { %p649_p3 = pnand %p647_p2, %p644_p1 }
 0x241   :  { %652 = shalt.err (!%p649_p3)
}
 0x242   :  { %390 = dma.vmem_to_hbm [thread:$0]  %s385_s8, 512, %s778_s5, [#allocation4], %s661_s30, %s661_s30, %s662_s6  }
 0x243   :  { %657 = dma.done.wait [#allocation4], 512  }
 0x244   :  { %658 = vsyncadd [#allocation4], 4294966784 }
 0x245   :  { %394 = vsyncpa [#allocation3], 1 }
 0x246   :  { %395 = vsyncpa [#allocation6], 1 }
 0x247   :  { %396 = vsyncpa [#allocation4], 1 }

</bundles_post_ra>
